<compile_context>
chip_gen: v6e
topology: v6e:2x2x1
jax: 0.10.0
libtpu: 0.0.40
codegen_flags: <defaults>
</compile_context>

<pallas_src>
import jax
import jax.numpy as jnp
from jax import lax
from jax.experimental import pallas as pl
from jax.experimental.pallas import tpu as pltpu

AUDIO_TOKEN_ID = 39
PAD_TOKEN_ID = 0
IGNORE_INDEX = -100

COMPUTE_DTYPE = jnp.bfloat16          # MXU operand dtype; accumulation is f32.
# Fits the default scoped VMEM on all generations at these shapes.  At
# production E=4096, raise per-generation (v5e default is only 16 MiB) and/or
# tile the E dimension of w1/w2 with an accumulator scratch.
_VMEM_LIMIT_BYTES = 32 * 1024 * 1024


def _round_up(x, m):
    return (x + m - 1) // m * m


def _resident_spec(block_shape, index_map):
    """Constant-index weight/table spec: fetched once, kept single-buffered."""
    return pl.BlockSpec(block_shape, index_map, pipeline_mode=pl.Buffered(1))


# --------------------- Pallas kernel 1: embedding lookup ---------------------
def _embed_onehot_kernel(ids_ref, table_ref, out_ref):
    ids = ids_ref[0]                                         # (TM, 1) int32
    tm = ids.shape[0]
    v = table_ref.shape[0]
    onehot = (ids == lax.broadcasted_iota(jnp.int32, (tm, v), 1))
    onehot = onehot.astype(table_ref.dtype)                  # exact 0/1 in bf16
    out_ref[...] = jnp.dot(onehot, table_ref[...],
                           preferred_element_type=jnp.float32
                           ).astype(out_ref.dtype)


def embedding_lookup(ids_flat, table, max_tile=128):
    """ids_flat: (N,) int32, table: (V, E) bf16 -> (N, E) bf16."""
    n = ids_flat.shape[0]
    v, e = table.shape
    tm = min(max_tile, _round_up(n, 8))       # sublane-dense token block
    n_pad = _round_up(n, tm)
    nb = n_pad // tm
    ids = jnp.pad(ids_flat, (0, n_pad - n)).reshape(nb, tm, 1)

    cost = pl.CostEstimate(
        flops=2 * n_pad * v * e,
        transcendentals=0,
        bytes_accessed=n_pad * 4 + v * e * 2 + n_pad * e * 2)

    out = pl.pallas_call(
        _embed_onehot_kernel,
        out_shape=jax.ShapeDtypeStruct((n_pad, e), table.dtype),
        grid=(nb,),
        in_specs=[
            pl.BlockSpec((1, tm, 1), lambda i: (i, 0, 0)),
            _resident_spec((v, e), lambda i: (0, 0)),
        ],
        out_specs=pl.BlockSpec((tm, e), lambda i: (i, 0)),
        compiler_params=pltpu.CompilerParams(
            dimension_semantics=("parallel",),
            vmem_limit_bytes=_VMEM_LIMIT_BYTES),
        cost_estimate=cost,
    )(ids, table)
    return out[:n]


# ----------------- Pallas kernel 2: ModalityProjector MLP --------------------
def _projector_mlp_kernel(x_ref, w1_ref, b1_ref, w2_ref, b2_ref, out_ref):
    h = jnp.dot(x_ref[...], w1_ref[...],
                preferred_element_type=jnp.float32) + b1_ref[...]   # (TM, E) f32
    h = h * jax.nn.sigmoid(h)                                       # SiLU (EUP)
    y = jnp.dot(h.astype(w2_ref.dtype), w2_ref[...],
                preferred_element_type=jnp.float32) + b2_ref[...]   # (TM, E) f32
    out_ref[...] = y.astype(out_ref.dtype)


def projector_mlp(x, w1, b1, w2, b2, max_tile=128):
    """x: (M, D_a) bf16 -> (M, E) bf16.  Linear -> SiLU -> Linear, M-tiled."""
    m, d_a = x.shape
    e = w1.shape[1]
    tm = min(max_tile, _round_up(m, 8))
    m_pad = _round_up(m, tm)
    nb = m_pad // tm
    x_p = jnp.pad(x, ((0, m_pad - m), (0, 0)))
    b1_2d = b1.reshape(1, e).astype(jnp.float32)
    b2_2d = b2.reshape(1, e).astype(jnp.float32)

    cost = pl.CostEstimate(
        flops=2 * m_pad * e * (d_a + e),
        transcendentals=m_pad * e,
        bytes_accessed=(m_pad * d_a + d_a * e + e * e + m_pad * e) * 2 + 2 * e * 4)

    out = pl.pallas_call(
        _projector_mlp_kernel,
        out_shape=jax.ShapeDtypeStruct((m_pad, e), x.dtype),
        grid=(nb,),
        in_specs=[
            pl.BlockSpec((tm, d_a), lambda i: (i, 0)),
            _resident_spec((d_a, e), lambda i: (0, 0)),
            _resident_spec((1, e), lambda i: (0, 0)),
            _resident_spec((e, e), lambda i: (0, 0)),
            _resident_spec((1, e), lambda i: (0, 0)),
        ],
        out_specs=pl.BlockSpec((tm, e), lambda i: (i, 0)),
        compiler_params=pltpu.CompilerParams(
            dimension_semantics=("parallel",),
            vmem_limit_bytes=_VMEM_LIMIT_BYTES),
        cost_estimate=cost,
    )(x_p, w1, b1_2d, w2, b2_2d)
    return out[:m]


# ------- glue: F.interpolate(mode='linear', align_corners=True) pre-step -----
def linear_interpolate_time(x, num_out):
    """(B, T, D) -> (B, num_out, D) as a VPU gather + lerp (too small for MXU)."""
    # TODO(synk): the original interpolate_vectors calls `.T` on the 3-D
    # wav2vec2 output (only well-defined for 2-D); interpreted here as
    # time-axis interpolation per batch element.
    _, t, _ = x.shape
    if num_out == 1:
        src = jnp.zeros((1,), jnp.float32)
    else:
        src = jnp.arange(num_out, dtype=jnp.float32) * (t - 1) / (num_out - 1)
    lo = jnp.floor(src).astype(jnp.int32)
    hi = jnp.minimum(lo + 1, t - 1)
    w_hi = (src - lo.astype(jnp.float32))[None, :, None]
    x_lo = jnp.take(x, lo, axis=1)
    x_hi = jnp.take(x, hi, axis=1)
    return x_lo * (1.0 - w_hi) + x_hi * w_hi


# -------------------- glue: LLaVA-style modality merge -----------------------
def merge_modalities(audio_features, inputs_embeds, input_ids, attention_mask,
                     labels):
    b, a, e = audio_features.shape
    _, s = input_ids.shape
    max_len = a - 1 + s

    special = input_ids == AUDIO_TOKEN_ID
    # NOTE: whole-batch left/right-padding decision + one-audio-token-per-prompt
    # fill mirror the HF LLaVA reference that the torch module adapts.
    left_padding = jnp.logical_not(
        jnp.sum(input_ids[:, -1] == PAD_TOKEN_ID) > 0)
    new_pos = jnp.cumsum(special.astype(jnp.int32) * (a - 1) + 1, axis=-1) - 1
    nb_audio_pad = max_len - 1 - new_pos[:, -1]
    new_pos = jnp.where(left_padding, new_pos + nb_audio_pad[:, None], new_pos)

    batch_idx = jnp.broadcast_to(jnp.arange(b)[:, None], (b, s))
    # audio-token slots are not text slots -> route them out of bounds (dropped)
    dest_text = jnp.where(special, max_len, new_pos)

    final_emb = jnp.zeros((b, max_len, e), audio_features.dtype)
    final_emb = final_emb.at[batch_idx, dest_text].set(
        inputs_embeds.astype(audio_features.dtype), mode="drop")
    final_attn = jnp.zeros((b, max_len), attention_mask.dtype)
    final_attn = final_attn.at[batch_idx, dest_text].set(attention_mask,
                                                         mode="drop")
    final_labels = jnp.full((b, max_len), IGNORE_INDEX, labels.dtype)
    final_labels = final_labels.at[batch_idx, dest_text].set(labels, mode="drop")

    text_written = jnp.zeros((b, max_len), bool)
    text_written = text_written.at[batch_idx, dest_text].set(True, mode="drop")
    audio_to_overwrite = jnp.logical_not(text_written)
    audio_to_overwrite = jnp.logical_and(
        audio_to_overwrite,
        (jnp.cumsum(audio_to_overwrite, axis=-1) - 1) >= nb_audio_pad[:, None])

    rank = jnp.clip(jnp.cumsum(audio_to_overwrite, axis=-1) - 1, 0, a - 1)
    audio_fill = jnp.take_along_axis(audio_features, rank[:, :, None], axis=1)
    final_emb = jnp.where(audio_to_overwrite[:, :, None], audio_fill, final_emb)
    final_attn = jnp.where(audio_to_overwrite,
                           jnp.ones_like(final_attn), final_attn)

    pad_mask = input_ids == PAD_TOKEN_ID
    dest_pad = jnp.where(pad_mask, new_pos, max_len)
    final_emb = final_emb.at[batch_idx, dest_pad].set(0.0, mode="drop")

    return {"inputs_embeds": final_emb,
            "attention_mask": final_attn,
            "labels": final_labels}


# -------------------------------- forward ------------------------------------
def mm_llama_forward(input_ids, attention_mask, labels, acoustic_hidden,
                     embed_table, w1, b1, w2, b2, num_vectors=10):
    b, s = input_ids.shape
    e = embed_table.shape[1]

    table_c = embed_table.astype(COMPUTE_DTYPE)
    text_emb = embedding_lookup(input_ids.reshape(-1), table_c).reshape(b, s, e)

    interp = linear_interpolate_time(acoustic_hidden, num_vectors)  # (B, A, D_a)
    a = interp.shape[1]
    x_flat = interp.reshape(b * a, -1).astype(COMPUTE_DTYPE)        # (B*A, D_a)
    audio_feats = projector_mlp(x_flat,
                                w1.astype(COMPUTE_DTYPE), b1,
                                w2.astype(COMPUTE_DTYPE), b2).reshape(b, a, e)

    return merge_modalities(audio_feats, text_emb, input_ids, attention_mask,
                            labels)


if __name__ == "__main__":
    key = jax.random.PRNGKey(0)
    B, S = 2, 8                  # batch, text sequence length
    T_A, D_A, A = 16, 128, 10    # wav2vec2 frames, hidden (stand-in for 1024), num_vectors
    E = 256                      # llm hidden (stand-in for 4096)
    V = AUDIO_TOKEN_ID + 1       # resize_token_embeddings(audio_token_id + 1)

    k_emb, k_ac, k_w1, k_b1, k_w2, k_b2 = jax.random.split(key, 6)
    embed_table = jax.random.normal(k_emb, (V, E), jnp.float32) * 0.02
    w1 = jax.random.normal(k_w1, (D_A, E), jnp.float32) * 0.02   # proj1 (ac_dim -> t_dim)
    b1 = jax.random.normal(k_b1, (E,), jnp.float32) * 0.02
    w2 = jax.random.normal(k_w2, (E, E), jnp.float32) * 0.02     # proj2 (t_dim -> t_dim)
    b2 = jax.random.normal(k_b2, (E,), jnp.float32) * 0.02

    input_ids = jnp.array(
        [[5, 3, AUDIO_TOKEN_ID, 7, 2, 4, 1, PAD_TOKEN_ID],
         [6, AUDIO_TOKEN_ID, 8, 9, 2, 3, PAD_TOKEN_ID, PAD_TOKEN_ID]],
        jnp.int32)
    attention_mask = (input_ids != PAD_TOKEN_ID).astype(jnp.int32)
    labels = jnp.where(input_ids == PAD_TOKEN_ID, IGNORE_INDEX,
                       input_ids).astype(jnp.int32)

    # synthetic wav2vec2 last_hidden_state (pretrained encoder not reproduced)
    acoustic_hidden = jax.random.normal(k_ac, (B, T_A, D_A), jnp.float32)

    out = mm_llama_forward(input_ids, attention_mask, labels, acoustic_hidden,
                           embed_table, w1, b1, w2, b2, num_vectors=A)
    jax.block_until_ready(out)

    # ----------------------- lightweight correctness checks ------------------
    # embedding: one-hot bf16 matmul with f32 accumulation is exact
    table_c = embed_table.astype(COMPUTE_DTYPE)
    ref_emb = table_c[input_ids.reshape(-1)]
    got_emb = embedding_lookup(input_ids.reshape(-1), table_c)
    assert jnp.allclose(ref_emb.astype(jnp.float32), got_emb.astype(jnp.float32),
                        atol=1e-6), "embedding gather mismatch"

    # projector: same bf16 operands, f32 accumulation (verifies acc stays f32)
    interp = linear_interpolate_time(acoustic_hidden, A)
    x_bf = interp.reshape(B * A, D_A).astype(COMPUTE_DTYPE)
    h_ref = x_bf.astype(jnp.float32) @ w1.astype(COMPUTE_DTYPE).astype(jnp.float32) + b1
    h_ref = h_ref * jax.nn.sigmoid(h_ref)
    y_ref = (h_ref.astype(COMPUTE_DTYPE).astype(jnp.float32)
             @ w2.astype(COMPUTE_DTYPE).astype(jnp.float32) + b2)
    y_got = projector_mlp(x_bf, w1.astype(COMPUTE_DTYPE), b1,
                          w2.astype(COMPUTE_DTYPE), b2).astype(jnp.float32)
    assert jnp.allclose(y_ref, y_got, atol=1e-2, rtol=1e-2), "projector mismatch"

    assert out["inputs_embeds"].shape == (B, A - 1 + S, E)
    assert out["attention_mask"].shape == (B, A - 1 + S)
    assert out["labels"].shape == (B, A - 1 + S)

    print("KERNEL_OK")
</pallas_src>

<mosaic_0001>
module attributes {stable_mosaic.version = 11 : i64} {
  func.func @_embed_onehot_kernel(%arg0: i32, %arg1: memref<1x16x1xi32, #tpu.memory_space<vmem>>, %arg2: memref<40x256xbf16, #tpu.memory_space<vmem>>, %arg3: memref<16x256xbf16, #tpu.memory_space<vmem>>) attributes {dimension_semantics = [#tpu.dimension_semantics<parallel>], iteration_bounds = array<i64: 1>, scalar_prefetch = 0 : i64, scratch_operands = 0 : i64, tpu.core_type = #tpu.core_type<tc>, window_params = [{transform_indices = @transform_0, window_bounds = array<i64: 1, 16, 1>}, {pipeline_mode = #tpu.pipeline_mode<synchronous>, transform_indices = @transform_1, window_bounds = array<i64: 40, 256>}, {transform_indices = @transform_2, window_bounds = array<i64: 16, 256>}]} {
    %c0 = arith.constant 0 : index
    %c0_0 = arith.constant 0 : index
    %c0_1 = arith.constant 0 : index
    %0 = vector.load %arg1[%c0, %c0_0, %c0_1] : memref<1x16x1xi32, #tpu.memory_space<vmem>>, vector<1x16x1xi32>
    %1 = vector.shape_cast %0 : vector<1x16x1xi32> to vector<16x1xi32>
    %2 = tpu.iota {dimensions = array<i32: 1>} : vector<16x40xi32>
    %3 = vector.broadcast %1 : vector<16x1xi32> to vector<16x40xi32>
    %4 = arith.cmpi eq, %3, %2 : vector<16x40xi32>
    %5 = arith.extui %4 : vector<16x40xi1> to vector<16x40xi32>
    %6 = arith.sitofp %5 : vector<16x40xi32> to vector<16x40xf32>
    %7 = arith.truncf %6 : vector<16x40xf32> to vector<16x40xbf16>
    %c0_2 = arith.constant 0 : index
    %c0_3 = arith.constant 0 : index
    %8 = vector.load %arg2[%c0_2, %c0_3] : memref<40x256xbf16, #tpu.memory_space<vmem>>, vector<40x256xbf16>
    %cst = arith.constant dense<0.000000e+00> : vector<16x256xf32>
    %9 = tpu.matmul %7, %8, %cst {dimension_numbers = #tpu.dot_dimension_numbers<[1], [0], [0], [1], [0, 0, 1, 1], [], []>} : vector<16x40xbf16>, vector<40x256xbf16>, vector<16x256xf32> -> vector<16x256xf32>
    %10 = arith.truncf %9 : vector<16x256xf32> to vector<16x256xbf16>
    %c0_4 = arith.constant 0 : index
    %c0_5 = arith.constant 0 : index
    %11 = vector.load %arg3[%c0_4, %c0_5] : memref<16x256xbf16, #tpu.memory_space<vmem>>, vector<16x256xbf16>
    tpu.vector_store %arg3[%c0_4, %c0_5], %10 {strides = array<i32>} : memref<16x256xbf16, #tpu.memory_space<vmem>>, vector<16x256xbf16>,
    return
  }
  func.func @transform_0(%arg0: i32) -> (i32, i32, i32) {
    %c0_i32 = arith.constant 0 : i32
    %c0_i32_0 = arith.constant 0 : i32
    %c0_i32_1 = arith.constant 0 : i32
    return %arg0, %c0_i32, %c0_i32_0 : i32, i32, i32
  }
  func.func @transform_1(%arg0: i32) -> (i32, i32) {
    %c0_i32 = arith.constant 0 : i32
    %c0_i32_0 = arith.constant 0 : i32
    %c0_i32_1 = arith.constant 0 : i32
    return %c0_i32, %c0_i32_0 : i32, i32
  }
  func.func @transform_2(%arg0: i32) -> (i32, i32) {
    %c0_i32 = arith.constant 0 : i32
    %c0_i32_0 = arith.constant 0 : i32
    return %arg0, %c0_i32 : i32, i32
  }
}

</mosaic_0001>

<bundles_post_ra>
// kernel: tpu_custom_call.1
= control target key start
LH: loop header
LB: loop body
LE: loop exit
PB: predicated region body
PF: predicated region fallthrough
CT: control target
= control target key end

     0   :  { %7 = vsyncpa [#allocation3], 0  ;;  %s271_s0 = inlined_call_operand.vmem [shape: s32[1,16,1], index: 0, kind: input, shape index: {}]   ;;  %s272_s1 = inlined_call_operand.hbm [shape: bf16[40,256], index: 1, kind: input, shape index: {}]   ;;  %s273_s2 = inlined_call_operand.hbm [shape: bf16[16,256], index: 2, kind: output, shape index: {}]  }
   0x1   :  { %8 = vsyncpa [#allocation4], 0  ;;  %s232_s9 = smov [#allocation2]  }
   0x2   :  { %s16_s10 = sshll.u32 %s232_s9, 4  ;;  %s17_s10 = int_to_ptr.vmem [resolvable:$true] %s16_s10 }
   0x3   :  { %s196_s11 = scalar_lea.vmem %s17_s10, 640  ;;  %p201_p1 = scmp.lt.s32.totalorder %s17_s10, %s17_s10 }
   0x4   :  { %p197_p0 = scmp.ne.s32.totalorder %s17_s10, %s196_s11  ;;  %p202_p2 = scmp.lt.s32.totalorder %s196_s11, %s196_s11 }
   0x6   :  { %p203_p3 = por %p202_p2, %p201_p1 }
   0x8   :  { %p204_p4 = pnand %p203_p3, %p197_p0 }
   0xa   :  { %207 = shalt.err (!%p204_p4)
}
   0xb   :  { %s233_s12 = smov 128   ;;  %s234_s13 = smov 8  }
   0xc   :  { %22 = dma.hbm_to_vmem [thread:$0]  %s272_s1, 640, %s17_s10, [#allocation3], %s233_s12, %s233_s12, %s234_s13  }
   0xd   :  { %228 = dma.done.wait [#allocation3], 640  }
   0xe   :  { %229 = vsyncadd [#allocation3], 4294966656  ;;  %v235_v0 = vmov 0   ;;  %v27_v1 = vld [vmem:[%s271_s0] sm:$0xff]  ;;  %vm78_vm0 = vcmask 1043456   ;;  %v28_v6 = vld [vmem:[%s271_s0 + $0x8] sm:$0xff]  ;;  %v29_v11 = vlaneseq }
   0xf   :  { %179 = vset.pattern.permute.xlu0 %v235_v0  ;;  %117 = vmatprep.mubr.bf16.mxu0 %v235_v0  ;;  %v48_v2 = vld [vmem:[#allocation2 + $0x20] sm:$0xff]  ;;  %v182_v5 = vld [vmem:[#allocation2 + $0x14] ss:$8 sps:$4 sm:$0xff]   ;;  %v184_v8 = vld [vmem:[#allocation2 + $0x10] ss:$8 sps:$4 sm:$0xff]   ;;  %v236_v15 = vmov 0.0  }
  0x10   :  { %32 = vperm.xlu0 %179, %v27_v1   ;;  %v166_v3 = vcombine.high %v48_v2, %v48_v2  ;;  %v165_v4 = vcombine.low %v48_v2, %v48_v2  ;;  %v185_v9 = vld [vmem:[#allocation2 + $0x4] ss:$8 sps:$4 sm:$0xff]   ;;  %v187_v10 = vld [vmem:[#allocation2] ss:$8 sps:$4 sm:$0xff]   ;;  %v30_v12 = vand.u32 127, %v29_v11  ;;  %vm74_vm3 = vcmask 326656  }
  0x11   :  { %s237_s0 = smov [#allocation5]  }
  0x12   :  { %167 = vmatprep.subr.msk.bf16.mxu0 %vm78_vm0, %v166_v3  ;;  %v80_v7 = vsel %vm78_vm0, %v165_v4, 0  ;;  %s147_s1 = sshll.u32 %s237_s0, 4  ;;  %s148_s1 = int_to_ptr.vmem [resolvable:$true] %s147_s1 }
  0x13   :  { %96 = vmatpush1.bf16.msra.mxu0 %v80_v7  ;;  %s208_s20 = scalar_lea.vmem %s148_s1, 256  ;;  %p213_p6 = scmp.lt.s32.totalorder %s148_s1, %s148_s1 }
  0x14   :  { %35 = vperm.xlu0 %179, %v28_v6   ;;  %97 = vmatprep.subr.bf16.mxu0 %v182_v5  ;;  %p209_p5 = scmp.ne.s32.totalorder %s148_s1, %s208_s20  ;;  %p214_p7 = scmp.lt.s32.totalorder %s208_s20, %s208_s20 }
  0x16   :  { %p215_p8 = por %p214_p7, %p213_p6 }
  0x17   :  { %98 = vmatpush1.bf16.msra.mxu0 %v184_v8 }
  0x18   :  { %99 = vmatprep.subr.bf16.mxu0 %v185_v9  ;;  %p216_p9 = pnand %p215_p8, %p209_p5 }
  0x1b   :  { %100 = vmatpush1.bf16.msra.mxu0 %v187_v10 }
  0x8b   :  { %v33_v13 = vpop.permute.xlu0 %32 }
  0x8c   :  { %vm37_vm1 = vcmp.eq.s32.totalorder %v33_v13, %v30_v12 }
  0x8d   :  { %v159_v16 = vsel %vm37_vm1, 1.0, %v236_v15 }
  0x8f   :  { %v36_v14 = vpop.permute.xlu0 %35 }
  0x90   :  { %vm38_vm2 = vcmp.eq.s32.totalorder %v36_v14, %v30_v12 }
  0x91   :  { %v160_v17 = vsel %vm38_vm2, 1.0, %v236_v15 }
  0x92   :  { %v43_v18 = vpack.c.bf16 %v160_v17, %v159_v16 }
  0x94   :  { %168 = vmatmul.mubr.msk.bf16.vlgmr.msra.gmra.mxu0 %vm74_vm3, %v43_v18 }
 0x154   :  { %v119_v19 = vpop.f32.mrf.mxu0 }
 0x156   :  { %v121_v20 = vpop.f32.mrf.mxu0 }
 0x157   :  { %v171_v21 = vpack.c.bf16 %v121_v20, %v119_v19 }
 0x158   :  { %v123_v22 = vpop.f32.mrf.mxu0 }
 0x159   :  { %140 = vst [vmem:[#allocation5] sm:$0xff] %v171_v21 }
 0x15a   :  { %v125_v23 = vpop.f32.mrf.mxu0 }
 0x15b   :  { %v172_v24 = vpack.c.bf16 %v125_v23, %v123_v22 }
 0x15d   :  { %141 = vst [vmem:[#allocation5 + $0x8] sm:$0xff] %v172_v24 }
 0x15e   :  { %219 = shalt.err (!%p216_p9)
}
 0x15f   :  { %153 = dma.vmem_to_hbm [thread:$0]  %s148_s1, 256, %s273_s2, [#allocation4], %s233_s12, %s233_s12, %s234_s13  }
 0x160   :  { %230 = dma.done.wait [#allocation4], 256  }
 0x161   :  { %231 = vsyncadd [#allocation4], 4294967040 }
 0x162   :  { %157 = vsyncpa [#allocation3], 1 }
 0x163   :  { %158 = vsyncpa [#allocation4], 1 }

</bundles_post_ra>
